<compile_context>
chip_gen: v6e
topology: v6e:2x2x1
jax: 0.10.0
libtpu: 0.0.40
codegen_flags: <defaults>
</compile_context>

<pallas_src>
import functools

import jax
import jax.numpy as jnp
from jax import lax
from jax.experimental import pallas as pl
from jax.experimental.pallas import tpu as pltpu

KSIZE = 7
PAD = 3        # spatial padding for kernel_size == 7
ROW_TOP = 8    # zero rows above the first stacked image (>= PAD, 8-aligned)
ROW_GAP = 8    # zero rows between stacked images (>= 2*PAD, 8-aligned)


def _round_up(x, m):
    return (x + m - 1) // m * m


def _spatial_attention_kernel(band_ref, x_ref, o_ref, maps_ref,
                              *, tb, h, w, stride):
    """band_ref: (KSIZE, kw, wo) f32   banded 7x7 conv weights (packed channels)
       x_ref:    (tb, C, h, w)         input block, native dtype
       o_ref:    (tb, 1, h, wo)        lane-dense output block
       maps_ref: (mp, kw) f32 scratch  stacked, zero-bordered [avg|max] maps
    """
    wo = o_ref.shape[3]
    mt = tb * stride - ROW_TOP          # output rows of the stacked matmul

    # Zero border rows / inter-image gaps / lane padding supply the conv's
    # spatial zero padding.  Re-zeroed every step (see header note on
    # "parallel" megacore safety); only the image interiors are written below.
    maps_ref[...] = jnp.zeros_like(maps_ref)

    # Channel mean / max for each image, written into the stacked scratch:
    # avg at lane offset 0, max packed at lane offset w (same lane tile).
    for b in range(tb):                 # tb is small and static
        xb = x_ref[b]                                     # (C, h, w) native
        avg = jnp.mean(xb, axis=0, dtype=jnp.float32)     # f32 accumulation
        mx = jnp.max(xb, axis=0).astype(jnp.float32)
        r0 = ROW_TOP + b * stride
        maps_ref[r0:r0 + h, 0:w] = avg
        maps_ref[r0:r0 + h, w:2 * w] = mx

    # One group of 7 banded MXU matmuls for ALL tb stacked images:
    #   acc[t, xo] = sum_ky maps[ROW_TOP - PAD + ky + t, :] @ band[ky][:, xo]
    # Default precision -> single bf16 MXU pass, f32 accumulation.
    maps = maps_ref[...]                                  # (mp, kw) f32
    acc = jnp.zeros((mt, wo), jnp.float32)
    for ky in range(KSIZE):
        r = ROW_TOP - PAD + ky
        acc = acc + jnp.dot(maps[r:r + mt, :], band_ref[ky],
                            preferred_element_type=jnp.float32)

    # Per-image output rows start at 8-aligned offsets b*stride within acc.
    for b in range(tb):
        rows = acc[b * stride:b * stride + h]
        o_ref[b, 0] = jax.nn.sigmoid(rows).astype(o_ref.dtype)


def _build_banded_weight(weight, w, kw, wo):
    """(1, 2, K, K) OIHW conv weight -> (KSIZE, kw, wo) band matrices with the
    two input channels packed at lane offsets 0 and w:

        band[ky, c*w + xi, xo] = weight[0, c, ky, xi - xo + PAD]
          for 0 <= xi - xo + PAD < KSIZE and xo < w;   0 elsewhere.

    The zero entries implement the horizontal zero padding and zero out the
    lane-padded output columns xo >= w.
    """
    wk = weight.reshape(2, KSIZE, KSIZE).astype(jnp.float32)
    xi = jnp.arange(w)[:, None]
    xo = jnp.arange(wo)[None, :]
    kx = xi - xo + PAD
    valid = (kx >= 0) & (kx < KSIZE) & (xo < w)
    taps = wk[:, :, jnp.clip(kx, 0, KSIZE - 1)]            # (2, K, w, wo)
    taps = jnp.where(valid[None, None], taps, 0.0)
    band = jnp.zeros((KSIZE, kw, wo), jnp.float32)
    band = band.at[:, 0:w, :].set(taps[0])
    band = band.at[:, w:2 * w, :].set(taps[1])
    return band


def _pick_batch_block(n, c, h, w, x_itemsize, o_itemsize, kw, wo, stride,
                      budget_bytes=10 << 20):
    """Largest tb (capped at 8) that divides n, keeps the grid >= 2 steps
    whenever n >= 2 (v7x dual-TC work + DMA/compute overlap), and fits the
    double-buffered x/out blocks, the single-buffered band and the stacked
    maps scratch inside a conservative VMEM budget (below v5e's 16 MiB scoped
    default).  Returns (tb, estimated_vmem_bytes)."""
    h8 = _round_up(h, 8)
    w128 = _round_up(w, 128)          # VMEM lane padding of the x block
    band_bytes = KSIZE * kw * wo * 4  # single-buffered (pl.Buffered(1))

    def vmem_bytes(tb):
        x_blk = 2 * tb * c * h8 * w128 * x_itemsize       # double-buffered
        o_blk = 2 * tb * h8 * wo * o_itemsize             # double-buffered
        maps = (ROW_TOP + tb * stride) * kw * 4           # scratch
        return x_blk + o_blk + band_bytes + maps

    tb_cap = n if n < 2 else n // 2   # keep the grid at least 2 steps long
    tb = 1
    for cand in range(1, min(tb_cap, 8) + 1):
        if n % cand == 0 and vmem_bytes(cand) <= budget_bytes:
            tb = cand
    return tb, vmem_bytes(tb)


@jax.jit
def spatial_attention(x, weight):
    """x: (N, C, H, W); weight: (1, 2, KSIZE, KSIZE) OIHW, no bias."""
    n, c, h, w = x.shape
    wo = _round_up(w, 128)            # lane-dense output width
    kw = _round_up(2 * w, 128)        # packed-channel contraction width
    stride = _round_up(h, 8) + ROW_GAP
    tb, vmem_need = _pick_batch_block(
        n, c, h, w, x.dtype.itemsize, x.dtype.itemsize, kw, wo, stride)
    mp = ROW_TOP + tb * stride        # stacked scratch rows (multiple of 8)

    # TODO(synk): for very large W (>~256) switch to 128-wide output-column
    # tiles with a fixed local Toeplitz band (O(1) band VMEM instead of
    # O(W^2)) and stream x lane-dense as (N, C, H*W); unnecessary at CBAM
    # spatial sizes (7..56).
    band = _build_banded_weight(weight, w, kw, wo)

    kernel = functools.partial(_spatial_attention_kernel,
                               tb=tb, h=h, w=w, stride=stride)

    out_padded = pl.pallas_call(
        kernel,
        out_shape=jax.ShapeDtypeStruct((n, 1, h, wo), x.dtype),
        grid_spec=pltpu.PrefetchScalarGridSpec(
            num_scalar_prefetch=0,
            grid=(n // tb,),
            in_specs=[
                # constant conv band: same block every step, single-buffered
                pl.BlockSpec((KSIZE, kw, wo), lambda i: (0, 0, 0),
                             pipeline_mode=pl.Buffered(1)),
                # tb batch images per step; trailing dims are full extents
                pl.BlockSpec((tb, c, h, w), lambda i: (i, 0, 0, 0)),
            ],
            out_specs=pl.BlockSpec((tb, 1, h, wo), lambda i: (i, 0, 0, 0)),
            scratch_shapes=[pltpu.VMEM((mp, kw), jnp.float32)],
        ),
        compiler_params=pltpu.CompilerParams(
            dimension_semantics=("parallel",),
            vmem_limit_bytes=int(min(max(2 * vmem_need, 16 << 20), 48 << 20)),
        ),
    )(band, x)

    return out_padded[:, :, :, :w]    # drop lane-padding columns


def _reference(x, weight):
    avg_out = jnp.mean(x, axis=1, keepdims=True)
    max_out = jnp.max(x, axis=1, keepdims=True)
    cat = jnp.concatenate([avg_out, max_out], axis=1)
    conv = lax.conv_general_dilated(
        cat, weight, window_strides=(1, 1),
        padding=((PAD, PAD), (PAD, PAD)),
        dimension_numbers=("NCHW", "OIHW", "NCHW"),
        precision=lax.Precision.HIGHEST)
    return jax.nn.sigmoid(conv)


if __name__ == "__main__":
    key = jax.random.PRNGKey(0)
    k_x, k_w = jax.random.split(key)

    N, C, H, W = 2, 4, 16, 16
    x = jax.random.normal(k_x, (N, C, H, W), dtype=jnp.float32)
    # deterministic synthetic conv weight (PyTorch shape: out=1, in=2, 7, 7)
    weight = 0.1 * jax.random.normal(k_w, (1, 2, KSIZE, KSIZE),
                                     dtype=jnp.float32)

    out = jax.block_until_ready(spatial_attention(x, weight))
    ref = _reference(x, weight)

    assert out.shape == (N, 1, H, W), out.shape
    # Default (single bf16 pass) MXU precision vs the HIGHEST-precision
    # reference: expected agreement is ~1e-3 after the sigmoid.
    assert jnp.allclose(out, ref, atol=1e-2, rtol=1e-2), (
        f"mismatch: {float(jnp.max(jnp.abs(out - ref)))}")

    print("KERNEL_OK")
</pallas_src>

<mosaic_0001>
module attributes {stable_mosaic.version = 11 : i64} {
  func.func @_spatial_attention_kernel(%arg0: i32, %arg1: memref<7x128x128xf32, #tpu.memory_space<vmem>>, %arg2: memref<1x4x16x16xf32, #tpu.memory_space<vmem>>, %arg3: memref<1x1x16x128xf32, #tpu.memory_space<vmem>>, %arg4: memref<32x128xf32, #tpu.memory_space<vmem>>) attributes {dimension_semantics = [#tpu.dimension_semantics<parallel>], iteration_bounds = array<i64: 2>, scalar_prefetch = 0 : i64, scratch_operands = 1 : i64, tpu.core_type = #tpu.core_type<tc>, window_params = [{pipeline_mode = #tpu.pipeline_mode<synchronous>, transform_indices = @transform_0, window_bounds = array<i64: 7, 128, 128>}, {transform_indices = @transform_1, window_bounds = array<i64: 1, 4, 16, 16>}, {transform_indices = @transform_2, window_bounds = array<i64: 1, 1, 16, 128>}]} {
    %cst = arith.constant 0.000000e+00 : f32
    %0 = vector.broadcast %cst : f32 to vector<32x128xf32>
    %c0 = arith.constant 0 : index
    %c0_0 = arith.constant 0 : index
    %1 = vector.load %arg4[%c0, %c0_0] : memref<32x128xf32, #tpu.memory_space<vmem>>, vector<32x128xf32>
    tpu.vector_store %arg4[%c0, %c0_0], %0 {strides = array<i32>} : memref<32x128xf32, #tpu.memory_space<vmem>>, vector<32x128xf32>,
    %c0_1 = arith.constant 0 : index
    %c0_2 = arith.constant 0 : index
    %c0_3 = arith.constant 0 : index
    %c0_4 = arith.constant 0 : index
    %2 = vector.load %arg2[%c0_1, %c0_2, %c0_3, %c0_4] : memref<1x4x16x16xf32, #tpu.memory_space<vmem>>, vector<1x4x16x16xf32>
    %3 = vector.shape_cast %2 : vector<1x4x16x16xf32> to vector<4x16x16xf32>
    %cst_5 = arith.constant dense<0.000000e+00> : vector<16x16xf32>
    %4 = vector.multi_reduction <add>, %3, %cst_5 [0] : vector<4x16x16xf32> to vector<16x16xf32>
    %cst_6 = arith.constant 4.000000e+00 : f32
    %5 = vector.broadcast %cst_6 : f32 to vector<16x16xf32>
    %6 = arith.divf %4, %5 : vector<16x16xf32>
    %cst_7 = arith.constant dense<0xFF800000> : vector<16x16xf32>
    %7 = vector.multi_reduction <maximumf>, %3, %cst_7 [0] : vector<4x16x16xf32> to vector<16x16xf32>
    %c8 = arith.constant 8 : index
    %c0_8 = arith.constant 0 : index
    %8 = vector.load %arg4[%c8, %c0_8] : memref<32x128xf32, #tpu.memory_space<vmem>>, vector<16x16xf32>
    tpu.vector_store %arg4[%c8, %c0_8], %6 {strides = array<i32>} : memref<32x128xf32, #tpu.memory_space<vmem>>, vector<16x16xf32>,
    %c8_9 = arith.constant 8 : index
    %c16 = arith.constant 16 : index
    %9 = vector.load %arg4[%c8_9, %c16] : memref<32x128xf32, #tpu.memory_space<vmem>>, vector<16x16xf32>
    tpu.vector_store %arg4[%c8_9, %c16], %7 {strides = array<i32>} : memref<32x128xf32, #tpu.memory_space<vmem>>, vector<16x16xf32>,
    %c0_10 = arith.constant 0 : index
    %c0_11 = arith.constant 0 : index
    %10 = vector.load %arg4[%c0_10, %c0_11] : memref<32x128xf32, #tpu.memory_space<vmem>>, vector<32x128xf32>
    %cst_12 = arith.constant 0.000000e+00 : f32
    %11 = vector.broadcast %cst_12 : f32 to vector<16x128xf32>
    %12 = vector.extract_strided_slice %10 {offsets = [5, 0], sizes = [16, 128], strides = [1, 1]} : vector<32x128xf32> to vector<16x128xf32>
    %c0_13 = arith.constant 0 : index
    %c0_14 = arith.constant 0 : index
    %c0_15 = arith.constant 0 : index
    %13 = vector.load %arg1[%c0_13, %c0_14, %c0_15] : memref<7x128x128xf32, #tpu.memory_space<vmem>>, vector<1x128x128xf32>
    %14 = vector.shape_cast %13 : vector<1x128x128xf32> to vector<128x128xf32>
    %cst_16 = arith.constant dense<0.000000e+00> : vector<16x128xf32>
    %15 = tpu.matmul %12, %14, %cst_16 {dimension_numbers = #tpu.dot_dimension_numbers<[1], [0], [0], [1], [0, 0, 1, 1], [], []>} : vector<16x128xf32>, vector<128x128xf32>, vector<16x128xf32> -> vector<16x128xf32>
    %16 = arith.addf %11, %15 : vector<16x128xf32>
    %17 = vector.extract_strided_slice %10 {offsets = [6, 0], sizes = [16, 128], strides = [1, 1]} : vector<32x128xf32> to vector<16x128xf32>
    %c1 = arith.constant 1 : index
    %c0_17 = arith.constant 0 : index
    %c0_18 = arith.constant 0 : index
    %18 = vector.load %arg1[%c1, %c0_17, %c0_18] : memref<7x128x128xf32, #tpu.memory_space<vmem>>, vector<1x128x128xf32>
    %19 = vector.shape_cast %18 : vector<1x128x128xf32> to vector<128x128xf32>
    %cst_19 = arith.constant dense<0.000000e+00> : vector<16x128xf32>
    %20 = tpu.matmul %17, %19, %cst_19 {dimension_numbers = #tpu.dot_dimension_numbers<[1], [0], [0], [1], [0, 0, 1, 1], [], []>} : vector<16x128xf32>, vector<128x128xf32>, vector<16x128xf32> -> vector<16x128xf32>
    %21 = arith.addf %16, %20 : vector<16x128xf32>
    %22 = vector.extract_strided_slice %10 {offsets = [7, 0], sizes = [16, 128], strides = [1, 1]} : vector<32x128xf32> to vector<16x128xf32>
    %c2 = arith.constant 2 : index
    %c0_20 = arith.constant 0 : index
    %c0_21 = arith.constant 0 : index
    %23 = vector.load %arg1[%c2, %c0_20, %c0_21] : memref<7x128x128xf32, #tpu.memory_space<vmem>>, vector<1x128x128xf32>
    %24 = vector.shape_cast %23 : vector<1x128x128xf32> to vector<128x128xf32>
    %cst_22 = arith.constant dense<0.000000e+00> : vector<16x128xf32>
    %25 = tpu.matmul %22, %24, %cst_22 {dimension_numbers = #tpu.dot_dimension_numbers<[1], [0], [0], [1], [0, 0, 1, 1], [], []>} : vector<16x128xf32>, vector<128x128xf32>, vector<16x128xf32> -> vector<16x128xf32>
    %26 = arith.addf %21, %25 : vector<16x128xf32>
    %27 = vector.extract_strided_slice %10 {offsets = [8, 0], sizes = [16, 128], strides = [1, 1]} : vector<32x128xf32> to vector<16x128xf32>
    %c3 = arith.constant 3 : index
    %c0_23 = arith.constant 0 : index
    %c0_24 = arith.constant 0 : index
    %28 = vector.load %arg1[%c3, %c0_23, %c0_24] : memref<7x128x128xf32, #tpu.memory_space<vmem>>, vector<1x128x128xf32>
    %29 = vector.shape_cast %28 : vector<1x128x128xf32> to vector<128x128xf32>
    %cst_25 = arith.constant dense<0.000000e+00> : vector<16x128xf32>
    %30 = tpu.matmul %27, %29, %cst_25 {dimension_numbers = #tpu.dot_dimension_numbers<[1], [0], [0], [1], [0, 0, 1, 1], [], []>} : vector<16x128xf32>, vector<128x128xf32>, vector<16x128xf32> -> vector<16x128xf32>
    %31 = arith.addf %26, %30 : vector<16x128xf32>
    %32 = vector.extract_strided_slice %10 {offsets = [9, 0], sizes = [16, 128], strides = [1, 1]} : vector<32x128xf32> to vector<16x128xf32>
    %c4 = arith.constant 4 : index
    %c0_26 = arith.constant 0 : index
    %c0_27 = arith.constant 0 : index
    %33 = vector.load %arg1[%c4, %c0_26, %c0_27] : memref<7x128x128xf32, #tpu.memory_space<vmem>>, vector<1x128x128xf32>
    %34 = vector.shape_cast %33 : vector<1x128x128xf32> to vector<128x128xf32>
    %cst_28 = arith.constant dense<0.000000e+00> : vector<16x128xf32>
    %35 = tpu.matmul %32, %34, %cst_28 {dimension_numbers = #tpu.dot_dimension_numbers<[1], [0], [0], [1], [0, 0, 1, 1], [], []>} : vector<16x128xf32>, vector<128x128xf32>, vector<16x128xf32> -> vector<16x128xf32>
    %36 = arith.addf %31, %35 : vector<16x128xf32>
    %37 = vector.extract_strided_slice %10 {offsets = [10, 0], sizes = [16, 128], strides = [1, 1]} : vector<32x128xf32> to vector<16x128xf32>
    %c5 = arith.constant 5 : index
    %c0_29 = arith.constant 0 : index
    %c0_30 = arith.constant 0 : index
    %38 = vector.load %arg1[%c5, %c0_29, %c0_30] : memref<7x128x128xf32, #tpu.memory_space<vmem>>, vector<1x128x128xf32>
    %39 = vector.shape_cast %38 : vector<1x128x128xf32> to vector<128x128xf32>
    %cst_31 = arith.constant dense<0.000000e+00> : vector<16x128xf32>
    %40 = tpu.matmul %37, %39, %cst_31 {dimension_numbers = #tpu.dot_dimension_numbers<[1], [0], [0], [1], [0, 0, 1, 1], [], []>} : vector<16x128xf32>, vector<128x128xf32>, vector<16x128xf32> -> vector<16x128xf32>
    %41 = arith.addf %36, %40 : vector<16x128xf32>
    %42 = vector.extract_strided_slice %10 {offsets = [11, 0], sizes = [16, 128], strides = [1, 1]} : vector<32x128xf32> to vector<16x128xf32>
    %c6 = arith.constant 6 : index
    %c0_32 = arith.constant 0 : index
    %c0_33 = arith.constant 0 : index
    %43 = vector.load %arg1[%c6, %c0_32, %c0_33] : memref<7x128x128xf32, #tpu.memory_space<vmem>>, vector<1x128x128xf32>
    %44 = vector.shape_cast %43 : vector<1x128x128xf32> to vector<128x128xf32>
    %cst_34 = arith.constant dense<0.000000e+00> : vector<16x128xf32>
    %45 = tpu.matmul %42, %44, %cst_34 {dimension_numbers = #tpu.dot_dimension_numbers<[1], [0], [0], [1], [0, 0, 1, 1], [], []>} : vector<16x128xf32>, vector<128x128xf32>, vector<16x128xf32> -> vector<16x128xf32>
    %46 = arith.addf %41, %45 : vector<16x128xf32>
    %47 = arith.negf %46 : vector<16x128xf32>
    %48 = math.exp %47 : vector<16x128xf32>
    %cst_35 = arith.constant 1.000000e+00 : f32
    %49 = vector.broadcast %cst_35 : f32 to vector<16x128xf32>
    %50 = arith.addf %49, %48 : vector<16x128xf32>
    %51 = arith.divf %49, %50 : vector<16x128xf32>
    %c0_36 = arith.constant 0 : index
    %c0_37 = arith.constant 0 : index
    %c0_38 = arith.constant 0 : index
    %c0_39 = arith.constant 0 : index
    %52 = vector.load %arg3[%c0_36, %c0_37, %c0_38, %c0_39] : memref<1x1x16x128xf32, #tpu.memory_space<vmem>>, vector<1x1x16x128xf32>
    %53 = vector.shape_cast %52 : vector<1x1x16x128xf32> to vector<16x128xf32>
    %54 = vector.shape_cast %51 : vector<16x128xf32> to vector<1x1x16x128xf32>
    tpu.vector_store %arg3[%c0_36, %c0_37, %c0_38, %c0_39], %54 {strides = array<i32>} : memref<1x1x16x128xf32, #tpu.memory_space<vmem>>, vector<1x1x16x128xf32>,
    return
  }
  func.func @transform_0(%arg0: i32) -> (i32, i32, i32) {
    %c0_i32 = arith.constant 0 : i32
    %c0_i32_0 = arith.constant 0 : i32
    %c0_i32_1 = arith.constant 0 : i32
    %c0_i32_2 = arith.constant 0 : i32
    return %c0_i32, %c0_i32_0, %c0_i32_1 : i32, i32, i32
  }
  func.func @transform_1(%arg0: i32) -> (i32, i32, i32, i32) {
    %c0_i32 = arith.constant 0 : i32
    %c0_i32_0 = arith.constant 0 : i32
    %c0_i32_1 = arith.constant 0 : i32
    %c0_i32_2 = arith.constant 0 : i32
    return %arg0, %c0_i32, %c0_i32_0, %c0_i32_1 : i32, i32, i32, i32
  }
  func.func @transform_2(%arg0: i32) -> (i32, i32, i32, i32) {
    %c0_i32 = arith.constant 0 : i32
    %c0_i32_0 = arith.constant 0 : i32
    %c0_i32_1 = arith.constant 0 : i32
    %c0_i32_2 = arith.constant 0 : i32
    return %arg0, %c0_i32, %c0_i32_0, %c0_i32_1 : i32, i32, i32, i32
  }
}

</mosaic_0001>

<bundles_post_ra>
// kernel: spatial_attention.1
= control target key start
LH: loop header
LB: loop body
LE: loop exit
PB: predicated region body
PF: predicated region fallthrough
CT: control target
= control target key end

     0   :  { %7 = vsyncpa [#allocation4], 0  ;;  %s2124_s0 = inlined_call_operand.vmem [shape: f32[7,128,128], index: 0, kind: input, shape index: {}]   ;;  %s2125_s1 = inlined_call_operand.vmem [shape: f32[2,4,16,16], index: 1, kind: input, shape index: {}]   ;;  %s2126_s2 = inlined_call_operand.hbm [shape: f32[2,1,16,128], index: 2, kind: output, shape index: {}]  }
   0x1   :  { %9 = vsyncpa [#allocation4 + $0x1], 0  ;;  %s1614_s9 = smov 0   ;;  %s1616_s10 = smov 0  }
   0x2   :  { %s1618_s11 = smov 0   ;;  %s1620_s12 = smov 0  }
   0x3 LB: > { %s1635_s13 = sadd.s32 4294967295, %s1592_s12   ;;  %s998_s14 = sadd.s32 4294967294, %s1592_s12   ;;  %s1592_s12 = sphi %s1620_s12, %s2132_s12   ;;  %s1588_s11 = sphi %s1618_s11, %s2131_s11   ;;  %s1584_s10 = sphi %s1616_s10, %s2130_s10   ;;  %s1580_s9 = sphi %s1614_s9, %s2129_s9  }
   0x4   : > { %s1639_s15 = sadd.s32 1, %s1592_s12   ;;  %s69_s16 = sadd.s32 1, %s1588_s11 }
   0x5   : > { %s66_s17 = ssub.s32 %s1592_s12, %s1639_s15  ;;  %p79_p0 = scmp.ne.s32.totalorder %s1588_s11, %s1584_s10 }
   0x6   : > { %p67_p1 = scmp.eq.s32.totalorder %s66_s17, 0  ;;  %p80_p2 = scmp.eq.s32.totalorder %s1635_s13, 1 }
   0x7   : > { %p85_p3 = scmp.ne.s32.totalorder %s1584_s10, %s1580_s9  ;;  %p86_p4 = scmp.eq.s32.totalorder %s998_s14, 1 }
   0x8   : > { %s1650_s18 = scalar_select %p67_p1, %s1588_s11, %s69_s16  }
   0x9   : > { %p1652_p5 = por %p80_p2, %p79_p0  ;;  %p1656_p6 = por %p86_p4, %p85_p3 }
   0xa   : > { %p1001_p7 = scmp.ge.s32.totalorder %s1592_s12, 1  ;;  %p115_p8 = scmp.lt.s32.totalorder %s1592_s12, 3 }
   0xc   : > { %p116_p9 = pnand %p1001_p7, %p115_p8 }
   0xd   : > { %p137_p10 = scmp.lt.s32.totalorder (!%p116_p9), %s1635_s13, 1  ;;  %s1595_s7 = smov (!%p116_p9), 16  }
   0xe   : > { %119 = sbr.rel (%p116_p9) target bundleno = 505 (0x1f9), region = 28  ;;  %s134_s23 = sand.u32 (!%p116_p9), 1, %s1584_s10  }
   0xf   : > { %s1002_s24 = sshll.u32 (!%p116_p9), %s134_s23, 4  ;;  %s1109_s25 = sshll.u32 (!%p116_p9), %s1635_s13, 8 }
  0x10   : > { %s136_s26 = scalar_lea.vmem (!%p116_p9), [#allocation3], %s1002_s24  ;;  %s2080_s30 = scalar_lea.hbm (!%p116_p9), %s2126_s2, %s1109_s25 }
  0x11   : > { %s936_s27 = sshll.u32 (!%p116_p9), %s136_s26, 4  ;;  %s2084_s3 = scalar_lea.sflag (!%p116_p9), [#allocation4], %s134_s23  ;;  %s2082_s27 = int_to_ptr.vmem [resolvable:$true] %s936_s27 }
  0x12   : > { %s1532_s4 = scalar_lea.vmem (!%p116_p9), %s2082_s27, 256 }
  0x13   : > { %v1020_v0 = vld [vmem:[%s2124_s0 + $0xf8] sm:$0xff]  ;;  %v1019_v2 = vld [vmem:[%s2124_s0 + $0xf0] sm:$0xff]  ;;  %s138_s29 = scalar_select %p137_p10, %s1635_s13, 1  ;;  %v1018_v4 = vld [vmem:[%s2124_s0 + $0xe8] sm:$0xff]  ;;  %v1594_v6 = vmov 0.0   ;;  %vm154_vm0 = vcmask 130048  }
  0x14   : > { %v218_v1 = vld [vmem:[%s2124_s0 + $0x78] sm:$0xff]  ;;  %1236 = vmatprep.subr.mxu0 %v1020_v0  ;;  %v217_v3 = vld [vmem:[%s2124_s0 + $0x70] sm:$0xff]  ;;  %v216_v5 = vld [vmem:[%s2124_s0 + $0x68] sm:$0xff]  ;;  %143 = vst [vmem:[#allocation2 + $0x8] sm:$0xff] %v1594_v6  ;;  %vm196_vm1 = vcmask 261248   ;;  %vm239_vm2 = vcmask 1041408   ;;  %p1533_p11 = scmp.ne.s32.totalorder %s2082_s27, %s1532_s4 }
  0x15   : > { %1271 = vmatprep.subr.mxu1 %v218_v1  ;;  %1237 = vmatpush3.msra.mxu0 %v1020_v0  ;;  %144 = vst [vmem:[#allocation2 + $0x10] sm:$0xff] %v1594_v6  ;;  %s1108_s6 = sshll.u32 %s138_s29, 6  ;;  %v1017_v7 = vld [vmem:[%s2124_s0 + $0xe0] sm:$0xff]  ;;  %v1016_v9 = vld [vmem:[%s2124_s0 + $0xd8] sm:$0xff]  ;;  %v1015_v19 = vld [vmem:[%s2124_s0 + $0xd0] sm:$0xff]  ;;  %vm322_vm3 = vcmask 1042432  }
  0x16   : > { %1272 = vmatpush3.msra.mxu1 %v218_v1  ;;  %1238 = vmatprep.subr.mxu0 %v1019_v2  ;;  %v215_v8 = vld [vmem:[%s2124_s0 + $0x60] sm:$0xff]  ;;  %s141_s22 = scalar_lea.vmem %s2125_s1, %s1108_s6  ;;  %v214_v10 = vld [vmem:[%s2124_s0 + $0x58] sm:$0xff]  ;;  %v213_v25 = vld [vmem:[%s2124_s0 + $0x50] sm:$0xff]  ;;  %vm422_vm4 = vcmask 1040384   ;;  %vm823_vm5 = vcmask 1044480   ;;  %vm619_vm6 = vcmask 1046528   ;;  %p1534_p12 = pnand %p1533_p11, %p1652_p5 }
  0x17   : > { %1273 = vmatprep.subr.mxu1 %v217_v3  ;;  %1239 = vmatpush3.msra.mxu0 %v1019_v2  ;;  %v146_v11 = vld [vmem:[%s141_s22] sm:$0xff]  ;;  %v148_v12 = vld [vmem:[%s141_s22 + $0x10] sm:$0xff]  ;;  %v147_v18 = vld [vmem:[%s141_s22 + $0x8] sm:$0xff]  ;;  %vm721_vm7 = vcmask 1045504   ;;  %s1596_s13 = smov [#allocation3]  }
  0x18   : > { %1274 = vmatpush3.msra.mxu1 %v217_v3  ;;  %1240 = vmatprep.subr.mxu0 %v1018_v4  ;;  %v150_v13 = vld [vmem:[%s141_s22 + $0x20] sm:$0xff]  ;;  %v152_v14 = vld [vmem:[%s141_s22 + $0x30] sm:$0xff]  ;;  %v156_v15 = vsel %vm154_vm0, %v148_v12, 0.0  ;;  %v172_v16 = vsel %vm154_vm0, %v146_v11, -inf  ;;  %v173_v17 = vsel %vm154_vm0, %v148_v12, -inf  ;;  %v155_v23 = vsel %vm154_vm0, %v146_v11, 0.0  ;;  %p1535_p13 = pneg %p1534_p12 }
  0x19   : > { %1275 = vmatprep.subr.mxu1 %v216_v5  ;;  %1241 = vmatpush3.msra.mxu0 %v1018_v4  ;;  %v158_v20 = vsel %vm154_vm0, %v150_v13, 0.0  ;;  %v174_v21 = vsel %vm154_vm0, %v150_v13, -inf  ;;  %v176_v22 = vsel %vm154_vm0, %v152_v14, -inf  ;;  %v149_v24 = vld [vmem:[%s141_s22 + $0x18] sm:$0xff]  ;;  %v157_v28 = vadd.f32 %v156_v15, %v155_v23  ;;  %v151_v29 = vld [vmem:[%s141_s22 + $0x28] sm:$0xff]  ;;  %v1013_v49 = vld [vmem:[%s2124_s0 + $0xc0] sm:$0xff] }
  0x1a   : > { %1276 = vmatpush3.msra.mxu1 %v216_v5  ;;  %1242 = vmatprep.subr.mxu0 %v1017_v7  ;;  %v175_v26 = vmax.f32 %v172_v16, %v174_v21  ;;  %v177_v27 = vmax.f32 %v173_v17, %v176_v22  ;;  %v153_v30 = vld [vmem:[%s141_s22 + $0x38] sm:$0xff]  ;;  %v162_v31 = vsel %vm154_vm0, %v147_v18, 0.0  ;;  %v160_v32 = vsel %vm154_vm0, %v152_v14, 0.0  ;;  %v1014_v40 = vld [vmem:[%s2124_s0 + $0xc8] sm:$0xff]  ;;  %v211_v50 = vld [vmem:[%s2124_s0 + $0x40] sm:$0xff]  ;;  %s1536_s5 = sshll.u32 %s1596_s13, 4  ;;  %s1537_s5 = int_to_ptr.vmem [resolvable:$false] %s1536_s5 }
  0x1b   : > { %1277 = vmatprep.subr.mxu1 %v215_v8  ;;  %1243 = vmatpush3.msra.mxu0 %v1017_v7  ;;  %v163_v33 = vsel %vm154_vm0, %v149_v24, 0.0  ;;  %v165_v34 = vsel %vm154_vm0, %v151_v29, 0.0  ;;  %v179_v35 = vsel %vm154_vm0, %v147_v18, -inf  ;;  %v159_v37 = vadd.f32 %v158_v20, %v157_v28  ;;  %v212_v41 = vld [vmem:[%s2124_s0 + $0x48] sm:$0xff]  ;;  %v1012_v53 = vld [vmem:[%s2124_s0 + $0xb8] sm:$0xff]  ;;  %v1011_v56 = vld [vmem:[%s2124_s0 + $0xb0] sm:$0xff]  ;;  %p1539_p0 = scmp.lt.s32.totalorder %s2082_s27, %s1537_s5 }
  0x1c   : > { %1278 = vmatpush3.msra.mxu1 %v215_v8  ;;  %1244 = vmatprep.subr.mxu0 %v1016_v9  ;;  %v178_v36 = vmax.f32 %v175_v26, %v177_v27  ;;  %v164_v38 = vadd.f32 %v163_v33, %v162_v31  ;;  %v180_v39 = vsel %vm154_vm0, %v149_v24, -inf  ;;  %v167_v42 = vsel %vm154_vm0, %v153_v30, 0.0  ;;  %v210_v55 = vld [vmem:[%s2124_s0 + $0x38] sm:$0xff]  ;;  %v209_v58 = vld [vmem:[%s2124_s0 + $0x30] sm:$0xff]  ;;  %v1010_v59 = vld [vmem:[%s2124_s0 + $0xa8] sm:$0xff]  ;;  %s1538_s6 = scalar_lea.vmem %s1537_s5, 512 }
  0x1d   : > { %1279 = vmatprep.subr.mxu1 %v214_v10  ;;  %1245 = vmatpush3.msra.mxu0 %v1016_v9  ;;  %v181_v43 = vsel %vm154_vm0, %v151_v29, -inf  ;;  %v183_v44 = vsel %vm154_vm0, %v153_v30, -inf  ;;  %v161_v45 = vadd.f32 %v160_v32, %v159_v37  ;;  %v208_v60 = vld [vmem:[%s2124_s0 + $0x28] sm:$0xff]  ;;  %v1009_v61 = vld [vmem:[%s2124_s0 + $0xa0] sm:$0xff]  ;;  %v1008_v63 = vld [vmem:[%s2124_s0 + $0x98] sm:$0xff]  ;;  %v240_v12 = vrot.slane %v1594_v6, 6  ;;  %p1540_p1 = scmp.lt.s32.totalorder %s1538_s6, %s1532_s4 }
  0x1e   : > { %1280 = vmatpush3.msra.mxu1 %v214_v10  ;;  %1246 = vmatprep.subr.mxu0 %v1015_v19  ;;  %v166_v46 = vadd.f32 %v165_v34, %v164_v38  ;;  %v182_v47 = vmax.f32 %v179_v35, %v181_v43  ;;  %v184_v48 = vmax.f32 %v180_v39, %v183_v44  ;;  %v207_v62 = vld [vmem:[%s2124_s0 + $0x20] sm:$0xff]  ;;  %v206_v0 = vld [vmem:[%s2124_s0 + $0x18] sm:$0xff]  ;;  %v1007_v1 = vld [vmem:[%s2124_s0 + $0x90] sm:$0xff]  ;;  %v323_v13 = vrot.slane %v1594_v6, 5 }
  0x1f   : > { %1281 = vmatprep.subr.mxu1 %v213_v25  ;;  %1247 = vmatpush3.msra.mxu0 %v1015_v19  ;;  %v170_v51 = vmul.f32 0.25, %v161_v45  ;;  %v205_v2 = vld [vmem:[%s2124_s0 + $0x10] sm:$0xff]  ;;  %v1006_v3 = vld [vmem:[%s2124_s0 + $0x88] sm:$0xff]  ;;  %v1005_v5 = vld [vmem:[%s2124_s0 + $0x80] sm:$0xff]  ;;  %v423_v20 = vrot.slane %v1594_v6, 7  ;;  %v827_v24 = vrot.slane %v1594_v6, 3  ;;  %p1541_p2 = por %p1540_p1, %p1539_p0 }
  0x20   : > { %1282 = vmatpush3.msra.mxu1 %v213_v25  ;;  %190 = vrot.lane.b32.xlu0 %v178_v36, %s1595_s7  ;;  %v185_v52 = vmax.f32 %v182_v47, %v184_v48  ;;  %v168_v54 = vadd.f32 %v167_v42, %v166_v46  ;;  %v204_v4 = vld [vmem:[%s2124_s0 + $0x8] sm:$0xff]  ;;  %v203_v7 = vld [vmem:[%s2124_s0] sm:$0xff]  ;;  %v1036_v8 = vld [vmem:[%s2124_s0 + $0x178] sm:$0xff] }
  0x21   : > { %1248 = vmatprep.subr.mxu0 %v1014_v40  ;;  %1283 = vmatprep.subr.mxu1 %v212_v41  ;;  %186 = vst.msk [vmem:[#allocation2 + $0x8] sm:$0xff] %vm154_vm0, %v170_v51  ;;  %v1052_v9 = vld [vmem:[%s2124_s0 + $0x1f8] sm:$0xff]  ;;  %v1035_v28 = vld [vmem:[%s2124_s0 + $0x170] sm:$0xff]  ;;  %v1034_v34 = vld [vmem:[%s2124_s0 + $0x168] sm:$0xff]  ;;  %p1542_p3 = pnand %p1541_p2, %p1535_p13 }
  0x22   : > { %1249 = vmatpush3.msra.mxu0 %v1014_v40  ;;  %1284 = vmatpush3.msra.mxu1 %v212_v41  ;;  %v171_v57 = vmul.f32 0.25, %v168_v54  ;;  %v1051_v30 = vld [vmem:[%s2124_s0 + $0x1f0] sm:$0xff]  ;;  %v1050_v35 = vld [vmem:[%s2124_s0 + $0x1e8] sm:$0xff]  ;;  %v1033_v36 = vld [vmem:[%s2124_s0 + $0x160] sm:$0xff] }
  0x23   : > { %1250 = vmatprep.subr.mxu0 %v1013_v49  ;;  %1285 = vmatprep.subr.mxu1 %v211_v50  ;;  %v1049_v37 = vld [vmem:[%s2124_s0 + $0x1e0] sm:$0xff]  ;;  %v1032_v38 = vld [vmem:[%s2124_s0 + $0x158] sm:$0xff]  ;;  %v1031_v40 = vld [vmem:[%s2124_s0 + $0x150] sm:$0xff] }
  0x24   : > { %192 = vrot.lane.b32.xlu0 %v185_v52, %s1595_s7  ;;  %1251 = vmatpush3.msra.mxu0 %v1013_v49  ;;  %187 = vst.msk [vmem:[#allocation2 + $0x10] sm:$0xff] %vm154_vm0, %v171_v57  ;;  %v1048_v39 = vld [vmem:[%s2124_s0 + $0x1d8] sm:$0xff]  ;;  %v1047_v41 = vld [vmem:[%s2124_s0 + $0x1d0] sm:$0xff]  ;;  %v1030_v42 = vld [vmem:[%s2124_s0 + $0x148] sm:$0xff] }
  0x25   : > { %1286 = vmatpush3.msra.mxu1 %v211_v50  ;;  %1252 = vmatprep.subr.mxu0 %v1012_v53  ;;  %v1046_v43 = vld [vmem:[%s2124_s0 + $0x1c8] sm:$0xff]  ;;  %v1029_v44 = vld [vmem:[%s2124_s0 + $0x140] sm:$0xff]  ;;  %v1028_v46 = vld [vmem:[%s2124_s0 + $0x138] sm:$0xff] }
  0x26   : > { %1287 = vmatprep.subr.mxu1 %v210_v55  ;;  %1253 = vmatpush3.msra.mxu0 %v1012_v53  ;;  %v1045_v45 = vld [vmem:[%s2124_s0 + $0x1c0] sm:$0xff]  ;;  %v1044_v47 = vld [vmem:[%s2124_s0 + $0x1b8] sm:$0xff]  ;;  %v1027_v48 = vld [vmem:[%s2124_s0 + $0x130] sm:$0xff] }
  0x27   : > { %1288 = vmatpush3.msra.mxu1 %v210_v55  ;;  %1254 = vmatprep.subr.mxu0 %v1011_v56  ;;  %v1043_v49 = vld [vmem:[%s2124_s0 + $0x1b0] sm:$0xff]  ;;  %v1026_v50 = vld [vmem:[%s2124_s0 + $0x128] sm:$0xff]  ;;  %v1025_v52 = vld [vmem:[%s2124_s0 + $0x120] sm:$0xff] }
  0x28   : > { %1289 = vmatprep.subr.mxu1 %v209_v58  ;;  %1255 = vmatpush3.msra.mxu0 %v1011_v56  ;;  %v1042_v51 = vld [vmem:[%s2124_s0 + $0x1a8] sm:$0xff]  ;;  %v1041_v53 = vld [vmem:[%s2124_s0 + $0x1a0] sm:$0xff]  ;;  %v1024_v54 = vld [vmem:[%s2124_s0 + $0x118] sm:$0xff] }
  0x29   : > { %1290 = vmatpush3.msra.mxu1 %v209_v58  ;;  %1256 = vmatprep.subr.mxu0 %v1010_v59  ;;  %v1040_v55 = vld [vmem:[%s2124_s0 + $0x198] sm:$0xff]  ;;  %v1023_v56 = vld [vmem:[%s2124_s0 + $0x110] sm:$0xff]  ;;  %v1022_v58 = vld [vmem:[%s2124_s0 + $0x108] sm:$0xff] }
  0x2a   : > { %1291 = vmatprep.subr.mxu1 %v208_v60  ;;  %1257 = vmatpush3.msra.mxu0 %v1010_v59  ;;  %v1039_v57 = vld [vmem:[%s2124_s0 + $0x190] sm:$0xff]  ;;  %v1038_v59 = vld [vmem:[%s2124_s0 + $0x188] sm:$0xff] }
  0x2b   : > { %1292 = vmatpush3.msra.mxu1 %v208_v60  ;;  %1258 = vmatprep.subr.mxu0 %v1009_v61  ;;  %v1021_v60 = vld [vmem:[%s2124_s0 + $0x100] sm:$0xff] }
  0x2c   : > { %1293 = vmatprep.subr.mxu1 %v207_v62  ;;  %1259 = vmatpush3.msra.mxu0 %v1009_v61  ;;  %v1037_v61 = vld [vmem:[%s2124_s0 + $0x180] sm:$0xff] }
  0x2d   : > { %1294 = vmatpush3.msra.mxu1 %v207_v62  ;;  %1260 = vmatprep.subr.mxu0 %v1008_v63 }
  0x2e   : > { %1295 = vmatprep.subr.mxu1 %v206_v0  ;;  %1261 = vmatpush3.msra.mxu0 %v1008_v63 }
  0x2f   : > { %1296 = vmatpush3.msra.mxu1 %v206_v0  ;;  %1262 = vmatprep.subr.mxu0 %v1007_v1  ;;  %v1068_v0 = vld [vmem:[%s2124_s0 + $0x278] sm:$0xff] }
  0x30   : > { %1297 = vmatprep.subr.mxu1 %v205_v2  ;;  %1263 = vmatpush3.msra.mxu0 %v1007_v1  ;;  %v1084_v1 = vld [vmem:[%s2124_s0 + $0x2f8] sm:$0xff] }
  0x31   : > { %1298 = vmatpush3.msra.mxu1 %v205_v2  ;;  %1264 = vmatprep.subr.mxu0 %v1006_v3 }
  0x32   : > { %1299 = vmatprep.subr.mxu1 %v204_v4  ;;  %1265 = vmatpush3.msra.mxu0 %v1006_v3 }
  0x33   : > { %1300 = vmatpush3.msra.mxu1 %v204_v4  ;;  %1266 = vmatprep.subr.mxu0 %v1005_v5 }
  0x34   : > { %1301 = vmatprep.subr.mxu1 %v203_v7  ;;  %1267 = vmatpush3.msra.mxu0 %v1005_v5 }
  0x35   : > { %1302 = vmatpush3.msra.mxu1 %v203_v7  ;;  %1306 = vmatprep.subr.mxu0 %v1036_v8 }
  0x36   : > { %1341 = vmatprep.subr.mxu1 %v1052_v9 }
  0x92   : > { %v191_v10 = vpop.permute.xlu0 %190 }
  0x93   : > { %197 = vst.msk [vmem:[#allocation2 + $0x8] sm:$0xff] %vm196_vm1, %v191_v10 }
  0x96   : > { %v193_v11 = vpop.permute.xlu0 %192 }
  0x97   : > { %198 = vst.msk [vmem:[#allocation2 + $0x10] sm:$0xff] %vm196_vm1, %v193_v11  ;;  %v1066_v11 = vld [vmem:[%s2124_s0 + $0x268] sm:$0xff] }
  0x9a   : > { %v1791_v14 = vld [vmem:[#allocation2 + $0x8] sm:$0xff] }
  0x9b   : > { %v241_v15 = vrot.slane %v1791_v14, 6  ;;  %v324_v16 = vrot.slane %v1791_v14, 5  ;;  %v424_v23 = vrot.slane %v1791_v14, 7  ;;  %v824_v29 = vrot.slane %v1791_v14, 3 }
  0x9c   : > { %v620_v4 = vrot.slane %v1791_v14, 1  ;;  %v722_v5 = vrot.slane %v1791_v14, 2 }
  0x9d   : > { %v242_v17 = vsel %vm239_vm2, %v240_v12, %v241_v15  ;;  %v325_v18 = vsel %vm322_vm3, %v323_v13, %v324_v16  ;;  %v425_v31 = vsel %vm422_vm4, %v423_v20, %v424_v23  ;;  %v1082_v12 = vld [vmem:[%s2124_s0 + $0x2e8] sm:$0xff]  ;;  %v1065_v13 = vld [vmem:[%s2124_s0 + $0x260] sm:$0xff] }
  0x9e   : > { %1268 = vmatprep.mubr.f32.mxu0 %v242_v17  ;;  %1303 = vmatprep.mubr.f32.mxu1 %v325_v18  ;;  %v1797_v19 = vld [vmem:[#allocation2 + $0x10] sm:$0xff]  ;;  %v1062_v20 = vld [vmem:[%s2124_s0 + $0x248] sm:$0xff] }
  0x9f   : > { %v243_v21 = vrot.slane %v1797_v19, 6  ;;  %v326_v22 = vrot.slane %v1797_v19, 5  ;;  %v825_v25 = vrot.slane %v1797_v19, 3  ;;  %v426_v62 = vrot.slane %v1797_v19, 7  ;;  %v1063_v17 = vld [vmem:[%s2124_s0 + $0x250] sm:$0xff] }
  0xa0   : > { %v621_v63 = vrot.slane %v1797_v19, 1  ;;  %v723_v2 = vrot.slane %v1797_v19, 2  ;;  %v1079_v18 = vld [vmem:[%s2124_s0 + $0x2d0] sm:$0xff] }
  0xa1   : > { %v244_v26 = vsel %vm239_vm2, %v241_v15, %v243_v21  ;;  %v327_v27 = vsel %vm322_vm3, %v324_v16, %v326_v22  ;;  %v1817_v32 = vsel %vm823_vm5, %v824_v29, %v825_v25  ;;  %v1819_v33 = vsel %vm823_vm5, %v825_v25, %v827_v24  ;;  %v1064_v15 = vld [vmem:[%s2124_s0 + $0x258] sm:$0xff]  ;;  %v1078_v21 = vld [vmem:[%s2124_s0 + $0x2c8] sm:$0xff]  ;;  %v1061_v22 = vld [vmem:[%s2124_s0 + $0x240] sm:$0xff] }
  0xa2   : > { %1269 = vmatmul.mubr.f32.vlgmr.msra.gmra.mxu0 %v244_v26  ;;  %1304 = vmatmul.mubr.f32.vlgmr.msra.gmra.mxu1 %v327_v27  ;;  %v427_v3 = vsel %vm422_vm4, %v424_v23, %v426_v62  ;;  %v622_v7 = vsel %vm619_vm6, %v620_v4, %v621_v63  ;;  %v724_v10 = vsel %vm721_vm7, %v722_v5, %v723_v2  ;;  %v1080_v16 = vld [vmem:[%s2124_s0 + $0x2d8] sm:$0xff]  ;;  %v1077_v23 = vld [vmem:[%s2124_s0 + $0x2c0] sm:$0xff]  ;;  %v1059_v26 = vld [vmem:[%s2124_s0 + $0x230] sm:$0xff] }
  0xa3   : > { %1307 = vmatpush3.msra.mxu0 %v1036_v8  ;;  %1342 = vmatpush3.msra.mxu1 %v1052_v9  ;;  %v1067_v8 = vld [vmem:[%s2124_s0 + $0x270] sm:$0xff]  ;;  %v1060_v24 = vld [vmem:[%s2124_s0 + $0x238] sm:$0xff]  ;;  %v1074_v29 = vld [vmem:[%s2124_s0 + $0x2a8] sm:$0xff] }
  0xa4   : > { %1308 = vmatprep.subr.mxu0 %v1035_v28  ;;  %1338 = vmatprep.mubr.f32.mxu0 %v425_v31  ;;  %v1083_v9 = vld [vmem:[%s2124_s0 + $0x2f0] sm:$0xff]  ;;  %v1076_v25 = vld [vmem:[%s2124_s0 + $0x2b8] sm:$0xff]  ;;  %v1073_v31 = vld [vmem:[%s2124_s0 + $0x2a0] sm:$0xff] }
  0xa5   : > { %1343 = vmatprep.subr.mxu1 %v1051_v30  ;;  %1373 = vmatprep.mubr.f32.mxu1 %v1791_v14  ;;  %v1081_v14 = vld [vmem:[%s2124_s0 + $0x2e0] sm:$0xff]  ;;  %v1075_v27 = vld [vmem:[%s2124_s0 + $0x2b0] sm:$0xff] }
  0xa6   : > { %1309 = vmatpush3.msra.mxu0 %v1035_v28  ;;  %1344 = vmatpush3.msra.mxu1 %v1051_v30  ;;  %v1058_v28 = vld [vmem:[%s2124_s0 + $0x228] sm:$0xff]  ;;  %v1057_v30 = vld [vmem:[%s2124_s0 + $0x220] sm:$0xff] }
  0xa7   : > { %1310 = vmatprep.subr.mxu0 %v1034_v34  ;;  %1345 = vmatprep.subr.mxu1 %v1050_v35 }
  0xa8   : > { %1311 = vmatpush3.msra.mxu0 %v1034_v34  ;;  %1346 = vmatpush3.msra.mxu1 %v1050_v35  ;;  %v1056_v34 = vld [vmem:[%s2124_s0 + $0x218] sm:$0xff] }
  0xa9   : > { %1312 = vmatprep.subr.mxu0 %v1033_v36  ;;  %1347 = vmatprep.subr.mxu1 %v1049_v37  ;;  %v1072_v35 = vld [vmem:[%s2124_s0 + $0x298] sm:$0xff] }
  0xaa   : > { %1313 = vmatpush3.msra.mxu0 %v1033_v36  ;;  %1348 = vmatpush3.msra.mxu1 %v1049_v37  ;;  %v1055_v36 = vld [vmem:[%s2124_s0 + $0x210] sm:$0xff] }
  0xab   : > { %1314 = vmatprep.subr.mxu0 %v1032_v38  ;;  %1349 = vmatprep.subr.mxu1 %v1048_v39  ;;  %v1071_v37 = vld [vmem:[%s2124_s0 + $0x290] sm:$0xff] }
  0xac   : > { %1315 = vmatpush3.msra.mxu0 %v1032_v38  ;;  %1350 = vmatpush3.msra.mxu1 %v1048_v39  ;;  %v1054_v38 = vld [vmem:[%s2124_s0 + $0x208] sm:$0xff] }
  0xad   : > { %1316 = vmatprep.subr.mxu0 %v1031_v40  ;;  %1351 = vmatprep.subr.mxu1 %v1047_v41  ;;  %v1070_v39 = vld [vmem:[%s2124_s0 + $0x288] sm:$0xff] }
  0xae   : > { %1317 = vmatpush3.msra.mxu0 %v1031_v40  ;;  %1352 = vmatpush3.msra.mxu1 %v1047_v41  ;;  %v1053_v40 = vld [vmem:[%s2124_s0 + $0x200] sm:$0xff] }
  0xaf   : > { %1318 = vmatprep.subr.mxu0 %v1030_v42  ;;  %1353 = vmatprep.subr.mxu1 %v1046_v43  ;;  %v1069_v41 = vld [vmem:[%s2124_s0 + $0x280] sm:$0xff] }
  0xb0   : > { %1319 = vmatpush3.msra.mxu0 %v1030_v42  ;;  %1354 = vmatpush3.msra.mxu1 %v1046_v43  ;;  %v623_v42 = vrot.slane %v1594_v6, 1  ;;  %v725_v43 = vrot.slane %v1594_v6, 2 }
  0xb1   : > { %1320 = vmatprep.subr.mxu0 %v1029_v44  ;;  %1355 = vmatprep.subr.mxu1 %v1045_v45 }
  0xb2   : > { %1321 = vmatpush3.msra.mxu0 %v1029_v44  ;;  %1356 = vmatpush3.msra.mxu1 %v1045_v45  ;;  %v1100_v44 = vld [vmem:[%s2124_s0 + $0x378] sm:$0xff]  ;;  %v624_v45 = vsel %vm619_vm6, %v621_v63, %v623_v42  ;;  %v726_v6 = vsel %vm721_vm7, %v723_v2, %v725_v43 }
  0xb3   : > { %1322 = vmatprep.subr.mxu0 %v1028_v46  ;;  %1357 = vmatprep.subr.mxu1 %v1044_v47 }
  0xb4   : > { %1323 = vmatpush3.msra.mxu0 %v1028_v46  ;;  %1358 = vmatpush3.msra.mxu1 %v1044_v47  ;;  %v1099_v46 = vld [vmem:[%s2124_s0 + $0x370] sm:$0xff]  ;;  %v1098_v47 = vld [vmem:[%s2124_s0 + $0x368] sm:$0xff] }
  0xb5   : > { %1324 = vmatprep.subr.mxu0 %v1027_v48  ;;  %1359 = vmatprep.subr.mxu1 %v1043_v49 }
  0xb6   : > { %1325 = vmatpush3.msra.mxu0 %v1027_v48  ;;  %1360 = vmatpush3.msra.mxu1 %v1043_v49  ;;  %v1096_v48 = vld [vmem:[%s2124_s0 + $0x358] sm:$0xff]  ;;  %v1094_v49 = vld [vmem:[%s2124_s0 + $0x348] sm:$0xff] }
  0xb7   : > { %1326 = vmatprep.subr.mxu0 %v1026_v50  ;;  %1361 = vmatprep.subr.mxu1 %v1042_v51 }
  0xb8   : > { %1327 = vmatpush3.msra.mxu0 %v1026_v50  ;;  %1362 = vmatpush3.msra.mxu1 %v1042_v51  ;;  %v1093_v50 = vld [vmem:[%s2124_s0 + $0x340] sm:$0xff]  ;;  %v1092_v51 = vld [vmem:[%s2124_s0 + $0x338] sm:$0xff] }
  0xb9   : > { %1328 = vmatprep.subr.mxu0 %v1025_v52  ;;  %1363 = vmatprep.subr.mxu1 %v1041_v53 }
  0xba   : > { %1329 = vmatpush3.msra.mxu0 %v1025_v52  ;;  %1364 = vmatpush3.msra.mxu1 %v1041_v53  ;;  %v1091_v52 = vld [vmem:[%s2124_s0 + $0x330] sm:$0xff]  ;;  %v1090_v53 = vld [vmem:[%s2124_s0 + $0x328] sm:$0xff] }
  0xbb   : > { %1330 = vmatprep.subr.mxu0 %v1024_v54  ;;  %1365 = vmatprep.subr.mxu1 %v1040_v55 }
  0xbc   : > { %1331 = vmatpush3.msra.mxu0 %v1024_v54  ;;  %1366 = vmatpush3.msra.mxu1 %v1040_v55  ;;  %v1089_v54 = vld [vmem:[%s2124_s0 + $0x320] sm:$0xff]  ;;  %v1088_v55 = vld [vmem:[%s2124_s0 + $0x318] sm:$0xff] }
  0xbd   : > { %1332 = vmatprep.subr.mxu0 %v1023_v56  ;;  %1367 = vmatprep.subr.mxu1 %v1039_v57 }
  0xbe   : > { %1333 = vmatpush3.msra.mxu0 %v1023_v56  ;;  %1368 = vmatpush3.msra.mxu1 %v1039_v57  ;;  %v1087_v56 = vld [vmem:[%s2124_s0 + $0x310] sm:$0xff]  ;;  %v1086_v57 = vld [vmem:[%s2124_s0 + $0x308] sm:$0xff] }
  0xbf   : > { %1334 = vmatprep.subr.mxu0 %v1022_v58  ;;  %1369 = vmatprep.subr.mxu1 %v1038_v59 }
  0xc0   : > { %1335 = vmatpush3.msra.mxu0 %v1022_v58  ;;  %1370 = vmatpush3.msra.mxu1 %v1038_v59  ;;  %v1085_v58 = vld [vmem:[%s2124_s0 + $0x300] sm:$0xff] }
  0xc1   : > { %1336 = vmatprep.subr.mxu0 %v1021_v60  ;;  %1371 = vmatprep.subr.mxu1 %v1037_v61 }
  0xc2   : > { %1337 = vmatpush3.msra.mxu0 %v1021_v60  ;;  %1372 = vmatpush3.msra.mxu1 %v1037_v61 }
  0xc3   : > { %1339 = vmatmul.mubr.f32.vlgmr.msra.gmra.mxu0 %v427_v3  ;;  %1374 = vmatmul.mubr.f32.vlgmr.msra.gmra.mxu1 %v1797_v19  ;;  %v1097_v19 = vld [vmem:[%s2124_s0 + $0x360] sm:$0xff] }
  0xc4   : > { %1376 = vmatprep.subr.mxu0 %v1068_v0  ;;  %1411 = vmatprep.subr.mxu1 %v1084_v1 }
  0xc5   : > { %1377 = vmatpush3.msra.mxu0 %v1068_v0  ;;  %1408 = vmatprep.mubr.f32.mxu0 %v622_v7 }
  0xc6   : > { %1412 = vmatpush3.msra.mxu1 %v1084_v1  ;;  %1443 = vmatprep.mubr.f32.mxu1 %v724_v10 }
  0xc7   : > { %1378 = vmatprep.subr.mxu0 %v1067_v8  ;;  %1413 = vmatprep.subr.mxu1 %v1083_v9 }
  0xc8   : > { %1379 = vmatpush3.msra.mxu0 %v1067_v8  ;;  %1414 = vmatpush3.msra.mxu1 %v1083_v9 }
  0xc9   : > { %1380 = vmatprep.subr.mxu0 %v1066_v11  ;;  %1415 = vmatprep.subr.mxu1 %v1082_v12 }
  0xca   : > { %1381 = vmatpush3.msra.mxu0 %v1066_v11  ;;  %1416 = vmatpush3.msra.mxu1 %v1082_v12 }
  0xcb   : > { %1382 = vmatprep.subr.mxu0 %v1065_v13  ;;  %1417 = vmatprep.subr.mxu1 %v1081_v14 }
  0xcc   : > { %1383 = vmatpush3.msra.mxu0 %v1065_v13  ;;  %1418 = vmatpush3.msra.mxu1 %v1081_v14 }
  0xcd   : > { %1384 = vmatprep.subr.mxu0 %v1064_v15  ;;  %1419 = vmatprep.subr.mxu1 %v1080_v16 }
  0xce   : > { %1385 = vmatpush3.msra.mxu0 %v1064_v15  ;;  %1420 = vmatpush3.msra.mxu1 %v1080_v16 }
  0xcf   : > { %1386 = vmatprep.subr.mxu0 %v1063_v17  ;;  %1421 = vmatprep.subr.mxu1 %v1079_v18 }
  0xd0   : > { %1387 = vmatpush3.msra.mxu0 %v1063_v17  ;;  %1422 = vmatpush3.msra.mxu1 %v1079_v18 }
  0xd1   : > { %1388 = vmatprep.subr.mxu0 %v1062_v20  ;;  %1423 = vmatprep.subr.mxu1 %v1078_v21 }
  0xd2   : > { %1389 = vmatpush3.msra.mxu0 %v1062_v20  ;;  %1424 = vmatpush3.msra.mxu1 %v1078_v21 }
  0xd3   : > { %1390 = vmatprep.subr.mxu0 %v1061_v22  ;;  %1425 = vmatprep.subr.mxu1 %v1077_v23 }
  0xd4   : > { %1391 = vmatpush3.msra.mxu0 %v1061_v22  ;;  %1426 = vmatpush3.msra.mxu1 %v1077_v23 }
  0xd5   : > { %1392 = vmatprep.subr.mxu0 %v1060_v24  ;;  %1427 = vmatprep.subr.mxu1 %v1076_v25 }
  0xd6   : > { %1393 = vmatpush3.msra.mxu0 %v1060_v24  ;;  %1428 = vmatpush3.msra.mxu1 %v1076_v25 }
  0xd7   : > { %1394 = vmatprep.subr.mxu0 %v1059_v26  ;;  %1429 = vmatprep.subr.mxu1 %v1075_v27 }
  0xd8   : > { %1395 = vmatpush3.msra.mxu0 %v1059_v26  ;;  %1430 = vmatpush3.msra.mxu1 %v1075_v27 }
  0xd9   : > { %1396 = vmatprep.subr.mxu0 %v1058_v28  ;;  %1431 = vmatprep.subr.mxu1 %v1074_v29 }
  0xda   : > { %1397 = vmatpush3.msra.mxu0 %v1058_v28  ;;  %1432 = vmatpush3.msra.mxu1 %v1074_v29 }
  0xdb   : > { %1398 = vmatprep.subr.mxu0 %v1057_v30  ;;  %1433 = vmatprep.subr.mxu1 %v1073_v31 }
  0xdc   : > { %1399 = vmatpush3.msra.mxu0 %v1057_v30  ;;  %1434 = vmatpush3.msra.mxu1 %v1073_v31 }
  0xdd   : > { %1400 = vmatprep.subr.mxu0 %v1056_v34  ;;  %1435 = vmatprep.subr.mxu1 %v1072_v35 }
  0xde   : > { %1401 = vmatpush3.msra.mxu0 %v1056_v34  ;;  %1436 = vmatpush3.msra.mxu1 %v1072_v35 }
  0xdf   : > { %1402 = vmatprep.subr.mxu0 %v1055_v36  ;;  %1437 = vmatprep.subr.mxu1 %v1071_v37 }
  0xe0   : > { %1403 = vmatpush3.msra.mxu0 %v1055_v36  ;;  %1438 = vmatpush3.msra.mxu1 %v1071_v37 }
  0xe1   : > { %1404 = vmatprep.subr.mxu0 %v1054_v38  ;;  %1439 = vmatprep.subr.mxu1 %v1070_v39 }
  0xe2   : > { %1405 = vmatpush3.msra.mxu0 %v1054_v38  ;;  %1440 = vmatpush3.msra.mxu1 %v1070_v39 }
  0xe3   : > { %1406 = vmatprep.subr.mxu0 %v1053_v40  ;;  %1441 = vmatprep.subr.mxu1 %v1069_v41 }
  0xe4   : > { %1407 = vmatpush3.msra.mxu0 %v1053_v40  ;;  %1442 = vmatpush3.msra.mxu1 %v1069_v41 }
  0xe5   : > { %1409 = vmatmul.mubr.f32.vlgmr.msra.gmra.mxu0 %v624_v45  ;;  %1444 = vmatmul.mubr.f32.vlgmr.msra.gmra.mxu1 %v726_v6 }
  0xe6   : > { %1446 = vmatprep.subr.mxu0 %v1100_v44  ;;  %1478 = vmatprep.mubr.f32.mxu0 %v1817_v32  ;;  %v1095_v32 = vld [vmem:[%s2124_s0 + $0x350] sm:$0xff] }
  0xe7   : > { %1447 = vmatpush3.msra.mxu0 %v1100_v44 }
  0xe8   : > { %1448 = vmatprep.subr.mxu0 %v1099_v46 }
  0xe9   : > { %1449 = vmatpush3.msra.mxu0 %v1099_v46 }
  0xea   : > { %1450 = vmatprep.subr.mxu0 %v1098_v47 }
  0xeb   : > { %1451 = vmatpush3.msra.mxu0 %v1098_v47 }
  0xec   : > { %1452 = vmatprep.subr.mxu0 %v1097_v19 }
  0xed   : > { %1453 = vmatpush3.msra.mxu0 %v1097_v19 }
  0xee   : > { %1454 = vmatprep.subr.mxu0 %v1096_v48 }
  0xef   : > { %1455 = vmatpush3.msra.mxu0 %v1096_v48 }
  0xf0   : > { %1456 = vmatprep.subr.mxu0 %v1095_v32 }
  0xf1   : > { %1457 = vmatpush3.msra.mxu0 %v1095_v32 }
  0xf2   : > { %1458 = vmatprep.subr.mxu0 %v1094_v49 }
  0xf3   : > { %1459 = vmatpush3.msra.mxu0 %v1094_v49 }
  0xf4   : > { %1460 = vmatprep.subr.mxu0 %v1093_v50 }
  0xf5   : > { %1461 = vmatpush3.msra.mxu0 %v1093_v50 }
  0xf6   : > { %1462 = vmatprep.subr.mxu0 %v1092_v51 }
  0xf7   : > { %1463 = vmatpush3.msra.mxu0 %v1092_v51 }
  0xf8   : > { %1464 = vmatprep.subr.mxu0 %v1091_v52 }
  0xf9   : > { %1465 = vmatpush3.msra.mxu0 %v1091_v52 }
  0xfa   : > { %1466 = vmatprep.subr.mxu0 %v1090_v53 }
  0xfb   : > { %1467 = vmatpush3.msra.mxu0 %v1090_v53 }
  0xfc   : > { %1468 = vmatprep.subr.mxu0 %v1089_v54 }
  0xfd   : > { %1469 = vmatpush3.msra.mxu0 %v1089_v54 }
  0xfe   : > { %1470 = vmatprep.subr.mxu0 %v1088_v55 }
  0xff   : > { %1471 = vmatpush3.msra.mxu0 %v1088_v55 }
 0x100   : > { %1472 = vmatprep.subr.mxu0 %v1087_v56 }
 0x101   : > { %1473 = vmatpush3.msra.mxu0 %v1087_v56 }
 0x102   : > { %1474 = vmatprep.subr.mxu0 %v1086_v57 }
 0x103   : > { %1475 = vmatpush3.msra.mxu0 %v1086_v57 }
 0x104   : > { %1476 = vmatprep.subr.mxu0 %v1085_v58 }
 0x105   : > { %1477 = vmatpush3.msra.mxu0 %v1085_v58 }
 0x106   : > { %1479 = vmatmul.mubr.f32.vlgmr.msra.gmra.mxu0 %v1819_v33 }
 0x162   : > { %v1270_v59 = vpop.f32.mrf.mxu0  ;;  %v1305_v60 = vpop.f32.mrf.mxu1 }
 0x163   : > { %v402_v0 = vadd.f32 %v1305_v60, %v1270_v59 }
 0x164   : > { %v313_v61 = vpop.f32.mrf.mxu0  ;;  %v396_v63 = vpop.f32.mrf.mxu1 }
 0x165   : > { %v397_v2 = vadd.f32 %v396_v63, %v313_v61 }
 0x183   : > { %v1340_v62 = vpop.f32.mrf.mxu0  ;;  %v1375_v4 = vpop.f32.mrf.mxu1 }
 0x184   : > { %v506_v3 = vadd.f32 %v1340_v62, %v402_v0 }
 0x185   : > { %v496_v1 = vpop.f32.mrf.mxu0  ;;  %v590_v9 = vpop.f32.mrf.mxu1 }
 0x186   : > { %v505_v7 = vadd.f32 %v496_v1, %v397_v2  ;;  %v600_v8 = vadd.f32 %v1375_v4, %v506_v3 }
 0x188   : > { %v599_v11 = vadd.f32 %v590_v9, %v505_v7 }
 0x1a5   : > { %v1410_v5 = vpop.f32.mrf.mxu0  ;;  %v1445_v13 = vpop.f32.mrf.mxu1 }
 0x1a6   : > { %v703_v12 = vadd.f32 %v1410_v5, %v600_v8 }
 0x1a7   : > { %v693_v10 = vpop.f32.mrf.mxu0  ;;  %v795_v15 = vpop.f32.mrf.mxu1 }
 0x1a8   : > { %v702_v14 = vadd.f32 %v693_v10, %v599_v11  ;;  %v805_v33 = vadd.f32 %v1445_v13, %v703_v12 }
 0x1aa   : > { %v804_v17 = vadd.f32 %v795_v15, %v702_v14 }
 0x1c6   : > { %v1480_v16 = vpop.f32.mrf.mxu0 }
 0x1c7   : > { %v907_v18 = vadd.f32 %v1480_v16, %v805_v33 }
 0x1c8   : > { %v897_v20 = vpop.f32.mrf.mxu0 }
 0x1c9   : > { %v1102_v21 = vmul.f32 -1.442695, %v907_v18  ;;  %v906_v22 = vadd.f32 %v897_v20, %v804_v17 }
 0x1cb   : > { %1524 = vpow2.f32 %v1102_v21  ;;  %v1101_v23 = vmul.f32 -1.442695, %v906_v22 }
 0x1cd   : > { %1526 = vpow2.f32 %v1101_v23 }
 0x1d8   : > { %v1525_v24 = vpop.eup %1524 }
 0x1d9   : > { %v915_v25 = vadd.f32 1.0, %v1525_v24 }
 0x1da   : > { %v1527_v26 = vpop.eup %1526 }
 0x1db   : > { %1528 = vrcp.f32 %v915_v25  ;;  %v914_v27 = vadd.f32 1.0, %v1527_v26 }
 0x1dd   : > { %1530 = vrcp.f32 %v914_v27 }
 0x1e8   : > { %v1529_v28 = vpop.eup %1528 }
 0x1e9   : > { %921 = vst [vmem:[%s136_s26 + $0x8] sm:$0xff] %v1529_v28 }
 0x1ea   : > { %v1531_v29 = vpop.eup %1530 }
 0x1eb   : > { %920 = vst [vmem:[%s136_s26] sm:$0xff] %v1531_v29 }
 0x1ec   : > { %1545 = shalt.err (!%p1542_p3)
}
 0x1ed   : > { %s1546_s7 = scalar_lea.hbm %s2080_s30, 256  ;;  %s1550_s16 = scalar_lea.hbm %s2126_s2, 512 }
 0x1ee   : > { %p1547_p4 = scmp.ne.s32.totalorder %s2080_s30, %s1546_s7  ;;  %p1551_p9 = scmp.lt.s32.totalorder %s2080_s30, %s2126_s2 }
 0x1ef   : > { %p1552_p10 = scmp.lt.s32.totalorder %s1550_s16, %s1546_s7 }
 0x1f0   : > { %p1548_p7 = pnand %p1547_p4, %p1652_p5 }
 0x1f1   : > { %p1553_p11 = por %p1552_p10, %p1551_p9 }
 0x1f2   : > { %p1549_p8 = pneg %p1548_p7 }
 0x1f4   : > { %p1554_p12 = pnand %p1553_p11, %p1549_p8 }
 0x1f6   : > { %1557 = shalt.err (!%p1554_p12)
}
 0x1f7   : > { %s1597_s22 = smov 128   ;;  %s1598_s23 = smov 8  }
 0x1f8   : > { %1481 = dma.vmem_to_hbm [thread:$0]  (%p1652_p5), %s2082_s27, 256, %s2080_s30, %s2084_s3, %s1597_s22, %s1597_s22, %s1598_s23  }
 0x1f9 PF: > { %p1487_p13 = scmp.ge.s32.totalorder %s1592_s12, 2  ;;  %s951_s24 = sand.u32 1, %s1580_s9  }
 0x1fa   : > { %s952_s25 = scalar_lea.sflag [#allocation4], %s951_s24 }
 0x1fb   : > { %p1484_p0 = pnand %p1487_p13, %p1656_p6 }
 0x1fd   : > { %p1485_p1 = pneg %p1484_p0 }
 0x1ff   : > { %1575 = dma.done.wait (%p1485_p1), %s952_s25, 256  }
 0x200   : > { %1577 = vsyncadd (%p1485_p1), %s952_s25, 4294967040  ;;  %p12_p2 = scmp.ge.s32.totalorder %s1639_s15, 4   ;;  %s2129_s9 = smov %s1584_s10 }
 0x201   : > { %s2130_s10 = smov %s1588_s11  ;;  %s2131_s11 = smov %s1650_s18 }
 0x202   : > { %s2132_s12 = smov %s1639_s15  ;;  %14 = sbr.rel (!%p12_p2) target bundleno = 3 (0x3), region = 69 }
 0x207   :  { %957 = vsyncpa [#allocation4], 1 }
 0x208   :  { %959 = vsyncpa [#allocation4 + $0x1], 1 }

</bundles_post_ra>
